<compile_context>
chip_gen: v6e
topology: v6e:2x2x1
jax: 0.10.0
libtpu: 0.0.40
codegen_flags: <defaults>
</compile_context>

<pallas_src>
import functools
import math

import jax
import jax.numpy as jnp
from jax.experimental import pallas as pl
from jax.experimental.pallas import tpu as pltpu


# ----------------------------------------------------------------------------
# Pallas kernel: full encoder->decoder MLP chain (6 Linear layers, 4x ReLU,
# Sigmoid) for one batch tile.  Weights/biases are VMEM-resident across the
# batch grid (constant index_map).
# ----------------------------------------------------------------------------
def autoencoder_kernel(
    x_ref,
    w1_ref, b1_ref,   # encoder Linear(D   -> h0)
    w2_ref, b2_ref,   # encoder Linear(h0  -> h1)
    w3_ref, b3_ref,   # encoder Linear(h1  -> hL)   (latent)
    w4_ref, b4_ref,   # decoder Linear(hL  -> h1)
    w5_ref, b5_ref,   # decoder Linear(h1  -> h0)
    w6_ref, b6_ref,   # decoder Linear(h0  -> D)
    out_ref,
):
    h = x_ref[...]  # bf16 (TB, D)

    # --- encoder ---
    h = jnp.dot(h, w1_ref[...], preferred_element_type=jnp.float32) + b1_ref[...]
    h = jnp.maximum(h, 0.0).astype(jnp.bfloat16)
    h = jnp.dot(h, w2_ref[...], preferred_element_type=jnp.float32) + b2_ref[...]
    h = jnp.maximum(h, 0.0).astype(jnp.bfloat16)
    z = (jnp.dot(h, w3_ref[...], preferred_element_type=jnp.float32)
         + b3_ref[...]).astype(jnp.bfloat16)

    # --- decoder ---
    h = jnp.dot(z, w4_ref[...], preferred_element_type=jnp.float32) + b4_ref[...]
    h = jnp.maximum(h, 0.0).astype(jnp.bfloat16)
    h = jnp.dot(h, w5_ref[...], preferred_element_type=jnp.float32) + b5_ref[...]
    h = jnp.maximum(h, 0.0).astype(jnp.bfloat16)
    y = jnp.dot(h, w6_ref[...], preferred_element_type=jnp.float32) + b6_ref[...]

    # Stable sigmoid on the EUP: exp + approximate reciprocal (separate bundle
    # slot from the VPU/MXU, so nearly free).  Clamp guards exp(-y) overflow
    # for extremely negative logits; sigmoid(-30) ~ 1e-13 already.
    y = jnp.maximum(y, -30.0)
    out_ref[...] = pl.reciprocal(1.0 + jnp.exp(-y), approx=True)


def _round_up(n, m):
    return ((n + m - 1) // m) * m


@functools.partial(jax.jit, static_argnames=("image_size", "block_batch"))
def autoencoder_forward(x, weights, image_size, block_batch=512):
    """x: (B, C, H, W) float32.  weights: flat tuple of (W, b) pairs with W as
    (in_features, out_features) and b as (1, out_features).
    Returns (B,) + image_size float32."""
    B = x.shape[0]
    D = math.prod(image_size)                      # static Python int
    x_flat = x.reshape(B, D).astype(jnp.bfloat16)  # nn.Flatten + bf16 MXU path

    # Batch tile: multiple of 8 sublanes, at most `block_batch` rows.
    TB = min(block_batch, _round_up(B, 8))
    B_pad = _round_up(B, TB)
    if B_pad != B:
        x_flat = jnp.pad(x_flat, ((0, B_pad - B), (0, 0)))

    # Weights in bf16 (single-pass MXU); biases stay f32 for the f32 tail.
    ops = [w.astype(jnp.bfloat16) if i % 2 == 0 else w.astype(jnp.float32)
           for i, w in enumerate(weights)]

    grid = (B_pad // TB,)
    x_spec = pl.BlockSpec((TB, D), lambda i: (i, 0))
    out_spec = pl.BlockSpec((TB, D), lambda i: (i, 0))
    # Full-array weight/bias blocks with constant index_map -> VMEM-resident
    # across all batch tiles (no re-DMA per tile).
    w_specs = [pl.BlockSpec(w.shape, lambda i: (0, 0)) for w in ops]

    out_flat = pl.pallas_call(
        autoencoder_kernel,
        out_shape=jax.ShapeDtypeStruct((B_pad, D), jnp.float32),
        grid=grid,
        in_specs=[x_spec] + w_specs,
        out_specs=out_spec,
        compiler_params=pltpu.CompilerParams(
            dimension_semantics=("parallel",)),
    )(x_flat, *ops)

    # nn.Unflatten(1, image_size)
    return out_flat[:B].reshape((B,) + image_size)


# ----------------------------------------------------------------------------
# Deterministic parameter construction (synthetic, PyTorch-style uniform init)
# ----------------------------------------------------------------------------
def make_linear_params(key, in_features, out_features):
    kw, kb = jax.random.split(key)
    bound = 1.0 / (in_features ** 0.5)
    # Stored already transposed: (in_features, out_features) so y = x @ W + b.
    W = jax.random.uniform(kw, (in_features, out_features), jnp.float32,
                           minval=-bound, maxval=bound)
    # Bias as (1, out_features) so it broadcasts cleanly over batch rows.
    b = jax.random.uniform(kb, (1, out_features), jnp.float32,
                           minval=-bound, maxval=bound)
    return W, b


def make_autoencoder_params(key, image_size, hidden_layers):
    D = math.prod(image_size)
    h0, h1, hL = hidden_layers
    dims = [
        (D, h0),   # encoder linear 1
        (h0, h1),  # encoder linear 2
        (h1, hL),  # encoder linear 3 (latent)
        (hL, h1),  # decoder linear 1
        (h1, h0),  # decoder linear 2
        (h0, D),   # decoder linear 3
    ]
    keys = jax.random.split(key, len(dims))
    weights = []
    for k, (fin, fout) in zip(keys, dims):
        W, b = make_linear_params(k, fin, fout)
        weights.extend([W, b])
    return tuple(weights)


# ----------------------------------------------------------------------------
# Pure-JAX f32 reference for a sanity check
# ----------------------------------------------------------------------------
def reference_forward(x, weights, image_size):
    B = x.shape[0]
    h = x.reshape(B, -1)
    (w1, b1, w2, b2, w3, b3, w4, b4, w5, b5, w6, b6) = weights
    h = jnp.maximum(h @ w1 + b1, 0.0)
    h = jnp.maximum(h @ w2 + b2, 0.0)
    z = h @ w3 + b3
    h = jnp.maximum(z @ w4 + b4, 0.0)
    h = jnp.maximum(h @ w5 + b5, 0.0)
    y = h @ w6 + b6
    return jax.nn.sigmoid(y).reshape((B,) + image_size)


if __name__ == "__main__":
    # Module hyper-parameters (small, consistent with the forward pass):
    #   params = {'image_size': (1, 16, 16), 'hidden_layers': [128, 64, 32]}
    image_size = (1, 16, 16)
    hidden_layers = (128, 64, 32)
    batch = 8

    key = jax.random.PRNGKey(0)
    kx, kp = jax.random.split(key)

    x = jax.random.normal(kx, (batch,) + image_size, dtype=jnp.float32)
    weights = make_autoencoder_params(kp, image_size, hidden_layers)

    out = autoencoder_forward(x, weights, image_size)
    out = jax.block_until_ready(out)

    ref = reference_forward(x, weights, image_size)
    assert out.shape == (batch,) + image_size, out.shape
    # bf16 matmul operands + approx reciprocal -> ~1e-2-level deviation.
    max_err = float(jnp.max(jnp.abs(out - ref)))
    assert jnp.allclose(out, ref, atol=2e-2, rtol=2e-2), max_err

    print("KERNEL_OK")
</pallas_src>

<mosaic_0001>
module attributes {stable_mosaic.version = 11 : i64} {
  func.func @autoencoder_kernel(%arg0: i32, %arg1: memref<8x256xbf16, #tpu.memory_space<vmem>>, %arg2: memref<256x128xbf16, #tpu.memory_space<vmem>>, %arg3: memref<1x128xf32, #tpu.memory_space<vmem>>, %arg4: memref<128x64xbf16, #tpu.memory_space<vmem>>, %arg5: memref<1x64xf32, #tpu.memory_space<vmem>>, %arg6: memref<64x32xbf16, #tpu.memory_space<vmem>>, %arg7: memref<1x32xf32, #tpu.memory_space<vmem>>, %arg8: memref<32x64xbf16, #tpu.memory_space<vmem>>, %arg9: memref<1x64xf32, #tpu.memory_space<vmem>>, %arg10: memref<64x128xbf16, #tpu.memory_space<vmem>>, %arg11: memref<1x128xf32, #tpu.memory_space<vmem>>, %arg12: memref<128x256xbf16, #tpu.memory_space<vmem>>, %arg13: memref<1x256xf32, #tpu.memory_space<vmem>>, %arg14: memref<8x256xf32, #tpu.memory_space<vmem>>) attributes {dimension_semantics = [#tpu.dimension_semantics<parallel>], iteration_bounds = array<i64: 1>, scalar_prefetch = 0 : i64, scratch_operands = 0 : i64, tpu.core_type = #tpu.core_type<tc>, window_params = [{transform_indices = @transform_0, window_bounds = array<i64: 8, 256>}, {pipeline_mode = #tpu.pipeline_mode<synchronous>, transform_indices = @transform_1, window_bounds = array<i64: 256, 128>}, {pipeline_mode = #tpu.pipeline_mode<synchronous>, transform_indices = @transform_2, window_bounds = array<i64: 1, 128>}, {pipeline_mode = #tpu.pipeline_mode<synchronous>, transform_indices = @transform_3, window_bounds = array<i64: 128, 64>}, {pipeline_mode = #tpu.pipeline_mode<synchronous>, transform_indices = @transform_4, window_bounds = array<i64: 1, 64>}, {pipeline_mode = #tpu.pipeline_mode<synchronous>, transform_indices = @transform_5, window_bounds = array<i64: 64, 32>}, {pipeline_mode = #tpu.pipeline_mode<synchronous>, transform_indices = @transform_6, window_bounds = array<i64: 1, 32>}, {pipeline_mode = #tpu.pipeline_mode<synchronous>, transform_indices = @transform_7, window_bounds = array<i64: 32, 64>}, {pipeline_mode = #tpu.pipeline_mode<synchronous>, transform_indices = @transform_8, window_bounds = array<i64: 1, 64>}, {pipeline_mode = #tpu.pipeline_mode<synchronous>, transform_indices = @transform_9, window_bounds = array<i64: 64, 128>}, {pipeline_mode = #tpu.pipeline_mode<synchronous>, transform_indices = @transform_10, window_bounds = array<i64: 1, 128>}, {pipeline_mode = #tpu.pipeline_mode<synchronous>, transform_indices = @transform_11, window_bounds = array<i64: 128, 256>}, {pipeline_mode = #tpu.pipeline_mode<synchronous>, transform_indices = @transform_12, window_bounds = array<i64: 1, 256>}, {transform_indices = @transform_13, window_bounds = array<i64: 8, 256>}]} {
    %c0 = arith.constant 0 : index
    %c0_0 = arith.constant 0 : index
    %0 = vector.load %arg1[%c0, %c0_0] : memref<8x256xbf16, #tpu.memory_space<vmem>>, vector<8x256xbf16>
    %c0_1 = arith.constant 0 : index
    %c0_2 = arith.constant 0 : index
    %1 = vector.load %arg2[%c0_1, %c0_2] : memref<256x128xbf16, #tpu.memory_space<vmem>>, vector<256x128xbf16>
    %cst = arith.constant dense<0.000000e+00> : vector<8x128xf32>
    %2 = tpu.matmul %0, %1, %cst {dimension_numbers = #tpu.dot_dimension_numbers<[1], [0], [0], [1], [0, 0, 1, 1], [], []>} : vector<8x256xbf16>, vector<256x128xbf16>, vector<8x128xf32> -> vector<8x128xf32>
    %c0_3 = arith.constant 0 : index
    %c0_4 = arith.constant 0 : index
    %3 = vector.load %arg3[%c0_3, %c0_4] : memref<1x128xf32, #tpu.memory_space<vmem>>, vector<1x128xf32>
    %4 = vector.broadcast %3 : vector<1x128xf32> to vector<8x128xf32>
    %5 = arith.addf %2, %4 : vector<8x128xf32>
    %cst_5 = arith.constant 0.000000e+00 : f32
    %6 = vector.broadcast %cst_5 : f32 to vector<8x128xf32>
    %7 = arith.maximumf %5, %6 : vector<8x128xf32>
    %8 = arith.truncf %7 : vector<8x128xf32> to vector<8x128xbf16>
    %c0_6 = arith.constant 0 : index
    %c0_7 = arith.constant 0 : index
    %9 = vector.load %arg4[%c0_6, %c0_7] : memref<128x64xbf16, #tpu.memory_space<vmem>>, vector<128x64xbf16>
    %cst_8 = arith.constant dense<0.000000e+00> : vector<8x64xf32>
    %10 = tpu.matmul %8, %9, %cst_8 {dimension_numbers = #tpu.dot_dimension_numbers<[1], [0], [0], [1], [0, 0, 1, 1], [], []>} : vector<8x128xbf16>, vector<128x64xbf16>, vector<8x64xf32> -> vector<8x64xf32>
    %c0_9 = arith.constant 0 : index
    %c0_10 = arith.constant 0 : index
    %11 = vector.load %arg5[%c0_9, %c0_10] : memref<1x64xf32, #tpu.memory_space<vmem>>, vector<1x64xf32>
    %12 = vector.broadcast %11 : vector<1x64xf32> to vector<8x64xf32>
    %13 = arith.addf %10, %12 : vector<8x64xf32>
    %cst_11 = arith.constant 0.000000e+00 : f32
    %14 = vector.broadcast %cst_11 : f32 to vector<8x64xf32>
    %15 = arith.maximumf %13, %14 : vector<8x64xf32>
    %16 = arith.truncf %15 : vector<8x64xf32> to vector<8x64xbf16>
    %c0_12 = arith.constant 0 : index
    %c0_13 = arith.constant 0 : index
    %17 = vector.load %arg6[%c0_12, %c0_13] : memref<64x32xbf16, #tpu.memory_space<vmem>>, vector<64x32xbf16>
    %cst_14 = arith.constant dense<0.000000e+00> : vector<8x32xf32>
    %18 = tpu.matmul %16, %17, %cst_14 {dimension_numbers = #tpu.dot_dimension_numbers<[1], [0], [0], [1], [0, 0, 1, 1], [], []>} : vector<8x64xbf16>, vector<64x32xbf16>, vector<8x32xf32> -> vector<8x32xf32>
    %c0_15 = arith.constant 0 : index
    %c0_16 = arith.constant 0 : index
    %19 = vector.load %arg7[%c0_15, %c0_16] : memref<1x32xf32, #tpu.memory_space<vmem>>, vector<1x32xf32>
    %20 = vector.broadcast %19 : vector<1x32xf32> to vector<8x32xf32>
    %21 = arith.addf %18, %20 : vector<8x32xf32>
    %22 = arith.truncf %21 : vector<8x32xf32> to vector<8x32xbf16>
    %c0_17 = arith.constant 0 : index
    %c0_18 = arith.constant 0 : index
    %23 = vector.load %arg8[%c0_17, %c0_18] : memref<32x64xbf16, #tpu.memory_space<vmem>>, vector<32x64xbf16>
    %cst_19 = arith.constant dense<0.000000e+00> : vector<8x64xf32>
    %24 = tpu.matmul %22, %23, %cst_19 {dimension_numbers = #tpu.dot_dimension_numbers<[1], [0], [0], [1], [0, 0, 1, 1], [], []>} : vector<8x32xbf16>, vector<32x64xbf16>, vector<8x64xf32> -> vector<8x64xf32>
    %c0_20 = arith.constant 0 : index
    %c0_21 = arith.constant 0 : index
    %25 = vector.load %arg9[%c0_20, %c0_21] : memref<1x64xf32, #tpu.memory_space<vmem>>, vector<1x64xf32>
    %26 = vector.broadcast %25 : vector<1x64xf32> to vector<8x64xf32>
    %27 = arith.addf %24, %26 : vector<8x64xf32>
    %cst_22 = arith.constant 0.000000e+00 : f32
    %28 = vector.broadcast %cst_22 : f32 to vector<8x64xf32>
    %29 = arith.maximumf %27, %28 : vector<8x64xf32>
    %30 = arith.truncf %29 : vector<8x64xf32> to vector<8x64xbf16>
    %c0_23 = arith.constant 0 : index
    %c0_24 = arith.constant 0 : index
    %31 = vector.load %arg10[%c0_23, %c0_24] : memref<64x128xbf16, #tpu.memory_space<vmem>>, vector<64x128xbf16>
    %cst_25 = arith.constant dense<0.000000e+00> : vector<8x128xf32>
    %32 = tpu.matmul %30, %31, %cst_25 {dimension_numbers = #tpu.dot_dimension_numbers<[1], [0], [0], [1], [0, 0, 1, 1], [], []>} : vector<8x64xbf16>, vector<64x128xbf16>, vector<8x128xf32> -> vector<8x128xf32>
    %c0_26 = arith.constant 0 : index
    %c0_27 = arith.constant 0 : index
    %33 = vector.load %arg11[%c0_26, %c0_27] : memref<1x128xf32, #tpu.memory_space<vmem>>, vector<1x128xf32>
    %34 = vector.broadcast %33 : vector<1x128xf32> to vector<8x128xf32>
    %35 = arith.addf %32, %34 : vector<8x128xf32>
    %cst_28 = arith.constant 0.000000e+00 : f32
    %36 = vector.broadcast %cst_28 : f32 to vector<8x128xf32>
    %37 = arith.maximumf %35, %36 : vector<8x128xf32>
    %38 = arith.truncf %37 : vector<8x128xf32> to vector<8x128xbf16>
    %c0_29 = arith.constant 0 : index
    %c0_30 = arith.constant 0 : index
    %39 = vector.load %arg12[%c0_29, %c0_30] : memref<128x256xbf16, #tpu.memory_space<vmem>>, vector<128x256xbf16>
    %cst_31 = arith.constant dense<0.000000e+00> : vector<8x256xf32>
    %40 = tpu.matmul %38, %39, %cst_31 {dimension_numbers = #tpu.dot_dimension_numbers<[1], [0], [0], [1], [0, 0, 1, 1], [], []>} : vector<8x128xbf16>, vector<128x256xbf16>, vector<8x256xf32> -> vector<8x256xf32>
    %c0_32 = arith.constant 0 : index
    %c0_33 = arith.constant 0 : index
    %41 = vector.load %arg13[%c0_32, %c0_33] : memref<1x256xf32, #tpu.memory_space<vmem>>, vector<1x256xf32>
    %42 = vector.broadcast %41 : vector<1x256xf32> to vector<8x256xf32>
    %43 = arith.addf %40, %42 : vector<8x256xf32>
    %cst_34 = arith.constant -3.000000e+01 : f32
    %44 = vector.broadcast %cst_34 : f32 to vector<8x256xf32>
    %45 = arith.maximumf %43, %44 : vector<8x256xf32>
    %cst_35 = arith.constant 0.000000e+00 : f32
    %46 = vector.broadcast %cst_35 : f32 to vector<8x256xf32>
    %47 = arith.subf %46, %45 : vector<8x256xf32>
    %48 = math.exp %47 : vector<8x256xf32>
    %cst_36 = arith.constant 1.000000e+00 : f32
    %49 = vector.broadcast %cst_36 : f32 to vector<8x256xf32>
    %50 = arith.addf %49, %48 : vector<8x256xf32>
    %51 = tpu.reciprocal %50 {approx = true} : vector<8x256xf32> -> vector<8x256xf32>
    %c0_37 = arith.constant 0 : index
    %c0_38 = arith.constant 0 : index
    %52 = vector.load %arg14[%c0_37, %c0_38] : memref<8x256xf32, #tpu.memory_space<vmem>>, vector<8x256xf32>
    tpu.vector_store %arg14[%c0_37, %c0_38], %51 {strides = array<i32>} : memref<8x256xf32, #tpu.memory_space<vmem>>, vector<8x256xf32>,
    return
  }
  func.func @transform_0(%arg0: i32) -> (i32, i32) {
    %c0_i32 = arith.constant 0 : i32
    %c0_i32_0 = arith.constant 0 : i32
    return %arg0, %c0_i32 : i32, i32
  }
  func.func @transform_1(%arg0: i32) -> (i32, i32) {
    %c0_i32 = arith.constant 0 : i32
    %c0_i32_0 = arith.constant 0 : i32
    %c0_i32_1 = arith.constant 0 : i32
    return %c0_i32, %c0_i32_0 : i32, i32
  }
  func.func @transform_2(%arg0: i32) -> (i32, i32) {
    %c0_i32 = arith.constant 0 : i32
    %c0_i32_0 = arith.constant 0 : i32
    %c0_i32_1 = arith.constant 0 : i32
    return %c0_i32, %c0_i32_0 : i32, i32
  }
  func.func @transform_3(%arg0: i32) -> (i32, i32) {
    %c0_i32 = arith.constant 0 : i32
    %c0_i32_0 = arith.constant 0 : i32
    %c0_i32_1 = arith.constant 0 : i32
    return %c0_i32, %c0_i32_0 : i32, i32
  }
  func.func @transform_4(%arg0: i32) -> (i32, i32) {
    %c0_i32 = arith.constant 0 : i32
    %c0_i32_0 = arith.constant 0 : i32
    %c0_i32_1 = arith.constant 0 : i32
    return %c0_i32, %c0_i32_0 : i32, i32
  }
  func.func @transform_5(%arg0: i32) -> (i32, i32) {
    %c0_i32 = arith.constant 0 : i32
    %c0_i32_0 = arith.constant 0 : i32
    %c0_i32_1 = arith.constant 0 : i32
    return %c0_i32, %c0_i32_0 : i32, i32
  }
  func.func @transform_6(%arg0: i32) -> (i32, i32) {
    %c0_i32 = arith.constant 0 : i32
    %c0_i32_0 = arith.constant 0 : i32
    %c0_i32_1 = arith.constant 0 : i32
    return %c0_i32, %c0_i32_0 : i32, i32
  }
  func.func @transform_7(%arg0: i32) -> (i32, i32) {
    %c0_i32 = arith.constant 0 : i32
    %c0_i32_0 = arith.constant 0 : i32
    %c0_i32_1 = arith.constant 0 : i32
    return %c0_i32, %c0_i32_0 : i32, i32
  }
  func.func @transform_8(%arg0: i32) -> (i32, i32) {
    %c0_i32 = arith.constant 0 : i32
    %c0_i32_0 = arith.constant 0 : i32
    %c0_i32_1 = arith.constant 0 : i32
    return %c0_i32, %c0_i32_0 : i32, i32
  }
  func.func @transform_9(%arg0: i32) -> (i32, i32) {
    %c0_i32 = arith.constant 0 : i32
    %c0_i32_0 = arith.constant 0 : i32
    %c0_i32_1 = arith.constant 0 : i32
    return %c0_i32, %c0_i32_0 : i32, i32
  }
  func.func @transform_10(%arg0: i32) -> (i32, i32) {
    %c0_i32 = arith.constant 0 : i32
    %c0_i32_0 = arith.constant 0 : i32
    %c0_i32_1 = arith.constant 0 : i32
    return %c0_i32, %c0_i32_0 : i32, i32
  }
  func.func @transform_11(%arg0: i32) -> (i32, i32) {
    %c0_i32 = arith.constant 0 : i32
    %c0_i32_0 = arith.constant 0 : i32
    %c0_i32_1 = arith.constant 0 : i32
    return %c0_i32, %c0_i32_0 : i32, i32
  }
  func.func @transform_12(%arg0: i32) -> (i32, i32) {
    %c0_i32 = arith.constant 0 : i32
    %c0_i32_0 = arith.constant 0 : i32
    %c0_i32_1 = arith.constant 0 : i32
    return %c0_i32, %c0_i32_0 : i32, i32
  }
  func.func @transform_13(%arg0: i32) -> (i32, i32) {
    %c0_i32 = arith.constant 0 : i32
    %c0_i32_0 = arith.constant 0 : i32
    return %arg0, %c0_i32 : i32, i32
  }
}

</mosaic_0001>

<bundles_post_ra>
// kernel: autoencoder_forward.1
= control target key start
LH: loop header
LB: loop body
LE: loop exit
PB: predicated region body
PF: predicated region fallthrough
CT: control target
= control target key end

     0   :  { %v974_v1 = vmov 0.0   ;;  %vm975_vm0 = vmmov 0   ;;  %vm382_vm1 = vcmask 523264   ;;  %vm450_vm2 = vcmask 261120   ;;  %s1252_s1 = inlined_call_operand.vmem [shape: bf16[256,128], index: 1, kind: input, shape index: {}]   ;;  %s1253_s0 = inlined_call_operand.vmem [shape: bf16[8,256], index: 0, kind: input, shape index: {}]   ;;  %s1254_s3 = inlined_call_operand.vmem [shape: bf16[128,64], index: 3, kind: input, shape index: {}]   ;;  %s1255_s5 = inlined_call_operand.vmem [shape: bf16[64,32], index: 5, kind: input, shape index: {}]   ;;  %s1256_s2 = inlined_call_operand.vmem [shape: f32[1,128], index: 2, kind: input, shape index: {}]   ;;  %s1257_s7 = inlined_call_operand.vmem [shape: bf16[32,64], index: 7, kind: input, shape index: {}]   ;;  %s1258_s4 = inlined_call_operand.vmem [shape: f32[1,64], index: 4, kind: input, shape index: {}]   ;;  %s1259_s9 = inlined_call_operand.vmem [shape: bf16[64,128], index: 9, kind: input, shape index: {}]   ;;  %s1260_s6 = inlined_call_operand.vmem [shape: f32[1,32], index: 6, kind: input, shape index: {}]   ;;  %s1261_s11 = inlined_call_operand.vmem [shape: bf16[128,256], index: 11, kind: input, shape index: {}]   ;;  %s1262_s8 = inlined_call_operand.vmem [shape: f32[1,64], index: 8, kind: input, shape index: {}]   ;;  %s1263_s10 = inlined_call_operand.vmem [shape: f32[1,128], index: 10, kind: input, shape index: {}]   ;;  %s1264_s12 = inlined_call_operand.vmem [shape: f32[1,256], index: 12, kind: input, shape index: {}]   ;;  %s1265_s13 = inlined_call_operand.vmem [shape: f32[8,256], index: 13, kind: output, shape index: {}]  }
   0x1   :  { %v906_v0 = vld [vmem:[%s1252_s1 + $0x78] sm:$0xff]   ;;  %851 = vmatprep.subr.bf16.mxu1 %v974_v1  ;;  %v908_v3 = vld [vmem:[%s1252_s1 + $0x70] sm:$0xff]   ;;  %v910_v5 = vld [vmem:[%s1252_s1 + $0x68] sm:$0xff]   ;;  %867 = vmatprep.mubr.msk.bf16.mxu1 %vm975_vm0, %v974_v1 }
   0x2   :  { %v907_v2 = vld [vmem:[%s1252_s1 + $0x38] sm:$0xff]   ;;  %807 = vmatprep.subr.bf16.mxu0 %v906_v0  ;;  %v909_v4 = vld [vmem:[%s1252_s1 + $0x30] sm:$0xff]   ;;  %v911_v6 = vld [vmem:[%s1252_s1 + $0x28] sm:$0xff]  }
   0x3   :  { %808 = vmatpush3.bf16.msra.mxu0 %v907_v2  ;;  %v912_v7 = vld [vmem:[%s1252_s1 + $0x60] sm:$0xff]   ;;  %v914_v9 = vld [vmem:[%s1252_s1 + $0x58] sm:$0xff]   ;;  %v916_v11 = vld [vmem:[%s1252_s1 + $0x50] sm:$0xff]  }
   0x4   :  { %809 = vmatprep.subr.bf16.mxu0 %v908_v3  ;;  %v913_v8 = vld [vmem:[%s1252_s1 + $0x20] sm:$0xff]   ;;  %v915_v10 = vld [vmem:[%s1252_s1 + $0x18] sm:$0xff]   ;;  %v917_v15 = vld [vmem:[%s1252_s1 + $0x10] sm:$0xff]  }
   0x5   :  { %v45_v12 = vld [vmem:[%s1253_s0] sm:$0xff]  ;;  %v924_v14 = vld [vmem:[%s1254_s3 + $0x38] sm:$0xff]   ;;  %v918_v16 = vld [vmem:[%s1252_s1 + $0x48] sm:$0xff]  }
   0x6   :  { %v749_v13 = vcombine.high %v45_v12, %v45_v12  ;;  %852 = vmatpush3.bf16.msra.mxu1 %v924_v14  ;;  %v925_v17 = vld [vmem:[%s1254_s3 + $0x30] sm:$0xff]   ;;  %v919_v18 = vld [vmem:[%s1252_s1 + $0x8] sm:$0xff]   ;;  %v920_v19 = vld [vmem:[%s1252_s1 + $0x40] sm:$0xff]   ;;  %v748_v23 = vcombine.low %v45_v12, %v45_v12 }
   0x7   :  { %810 = vmatpush3.bf16.msra.mxu0 %v909_v4  ;;  %853 = vmatprep.subr.bf16.mxu1 %v974_v1  ;;  %v926_v20 = vld [vmem:[%s1254_s3 + $0x28] sm:$0xff]   ;;  %v921_v21 = vld [vmem:[%s1252_s1] sm:$0xff]   ;;  %v928_v24 = vld [vmem:[%s1254_s3 + $0x18] sm:$0xff]  }
   0x8   :  { %811 = vmatprep.subr.bf16.mxu0 %v910_v5  ;;  %220 = vmatprep.mubr.bf16.mxu0 %v749_v13  ;;  %v927_v22 = vld [vmem:[%s1254_s3 + $0x20] sm:$0xff]   ;;  %v929_v25 = vld [vmem:[%s1254_s3 + $0x10] sm:$0xff]   ;;  %v930_v26 = vld [vmem:[%s1254_s3 + $0x8] sm:$0xff]  }
   0x9   :  { %v931_v27 = vld [vmem:[%s1254_s3] sm:$0xff]   ;;  %v932_v36 = vld [vmem:[%s1255_s5 + $0x18] sm:$0xff]   ;;  %v933_v38 = vld [vmem:[%s1255_s5 + $0x10] sm:$0xff]  }
   0xa   :  { %854 = vmatpush3.bf16.msra.mxu1 %v925_v17  ;;  %v747_v29 = vld [vmem:[%s1256_s2] ss:$0 sm:$0xff]  ;;  %v934_v39 = vld [vmem:[%s1255_s5 + $0x8] sm:$0xff]   ;;  %v938_v55 = vld [vmem:[%s1259_s9 + $0x18] sm:$0xff]  }
   0xb   :  { %812 = vmatpush3.bf16.msra.mxu0 %v911_v6  ;;  %855 = vmatprep.subr.bf16.mxu1 %v974_v1  ;;  %v935_v40 = vld [vmem:[%s1255_s5] sm:$0xff]   ;;  %v936_v47 = vld [vmem:[%s1257_s7 + $0x8] sm:$0xff]   ;;  %v939_v59 = vld [vmem:[%s1259_s9 + $0x10] sm:$0xff]  }
   0xc   :  { %813 = vmatprep.subr.bf16.mxu0 %v912_v7  ;;  %v766_v41 = vld [vmem:[%s1258_s4] ss:$0 sm:$0xff]  ;;  %v940_v60 = vld [vmem:[%s1259_s9 + $0x8] sm:$0xff]   ;;  %v942_v62 = vld [vmem:[%s1261_s11 + $0x70] ss:$8 sps:$4 sm:$0xff]  }
   0xd   :  { %v937_v50 = vld [vmem:[%s1257_s7] sm:$0xff]   ;;  %v944_v63 = vld [vmem:[%s1261_s11 + $0x74] ss:$8 sps:$4 sm:$0xff]   ;;  %v948_v3 = vld [vmem:[%s1261_s11 + $0x50] ss:$8 sps:$4 sm:$0xff]  }
   0xe   :  { %856 = vmatpush3.bf16.msra.mxu1 %v926_v20  ;;  %v775_v51 = vld [vmem:[%s1260_s6] ss:$0 sm:$0xff]  ;;  %v947_v0 = vld [vmem:[%s1261_s11 + $0x64] ss:$8 sps:$4 sm:$0xff]   ;;  %v950_v2 = vld [vmem:[%s1261_s11 + $0x54] ss:$8 sps:$4 sm:$0xff]  }
   0xf   :  { %814 = vmatpush3.bf16.msra.mxu0 %v913_v8  ;;  %857 = vmatprep.subr.bf16.mxu1 %v974_v1  ;;  %v941_v61 = vld [vmem:[%s1259_s9] sm:$0xff]   ;;  %v956_v6 = vld [vmem:[%s1261_s11 + $0x34] ss:$8 sps:$4 sm:$0xff]   ;;  %v954_v7 = vld [vmem:[%s1261_s11 + $0x30] ss:$8 sps:$4 sm:$0xff]  }
  0x10   :  { %815 = vmatprep.subr.bf16.mxu0 %v914_v9  ;;  %v953_v4 = vld [vmem:[%s1261_s11 + $0x44] ss:$8 sps:$4 sm:$0xff]   ;;  %v951_v5 = vld [vmem:[%s1261_s11 + $0x40] ss:$8 sps:$4 sm:$0xff]  }
  0x11   :  { %v959_v8 = vld [vmem:[%s1261_s11 + $0x24] ss:$8 sps:$4 sm:$0xff]   ;;  %v957_v9 = vld [vmem:[%s1261_s11 + $0x20] ss:$8 sps:$4 sm:$0xff]  }
  0x12   :  { %858 = vmatpush3.bf16.msra.mxu1 %v927_v22  ;;  %v781_v12 = vld [vmem:[%s1262_s8] ss:$0 sm:$0xff]  ;;  %v965_v20 = vld [vmem:[%s1261_s11 + $0x4] ss:$8 sps:$4 sm:$0xff]   ;;  %v976_v22 = vmov 0  }
  0x13   :  { %816 = vmatpush3.bf16.msra.mxu0 %v915_v10  ;;  %859 = vmatprep.subr.bf16.mxu1 %v974_v1  ;;  %v962_v10 = vld [vmem:[%s1261_s11 + $0x14] ss:$8 sps:$4 sm:$0xff]  }
  0x14   :  { %817 = vmatprep.subr.bf16.mxu0 %v916_v11  ;;  %v960_v11 = vld [vmem:[%s1261_s11 + $0x10] ss:$8 sps:$4 sm:$0xff]  }
  0x16   :  { %860 = vmatpush3.bf16.msra.mxu1 %v928_v24 }
  0x17   :  { %818 = vmatpush3.bf16.msra.mxu0 %v917_v15  ;;  %861 = vmatprep.subr.bf16.mxu1 %v974_v1 }
  0x18   :  { %819 = vmatprep.subr.bf16.mxu0 %v918_v16 }
  0x1a   :  { %862 = vmatpush3.bf16.msra.mxu1 %v929_v25 }
  0x1b   :  { %820 = vmatpush3.bf16.msra.mxu0 %v919_v18  ;;  %863 = vmatprep.subr.bf16.mxu1 %v974_v1 }
  0x1c   :  { %821 = vmatprep.subr.bf16.mxu0 %v920_v19 }
  0x1e   :  { %864 = vmatpush3.bf16.msra.mxu1 %v930_v26 }
  0x1f   :  { %822 = vmatpush3.bf16.msra.mxu0 %v921_v21  ;;  %865 = vmatprep.subr.bf16.mxu1 %v974_v1  ;;  %v963_v21 = vld [vmem:[%s1261_s11] ss:$8 sps:$4 sm:$0xff]  }
  0x20   :  { %688 = vmatprep.subr.bf16.mxu0 %v944_v63 }
  0x22   :  { %221 = vmatmul.mubr.bf16.vlgmr.msra.gmra.mxu0 %v748_v23  ;;  %866 = vmatpush3.bf16.msra.mxu1 %v931_v27  ;;  %v785_v23 = vld [vmem:[%s1263_s10] ss:$0 sm:$0xff] }
  0x23   :  { %871 = vmatprep.subr.bf16.mxu1 %v974_v1  ;;  %689 = vmatpush1.bf16.msra.mxu0 %v942_v62 }
  0x24   :  { %690 = vmatprep.subr.bf16.mxu0 %v947_v0  ;;  %720 = vmatprep.mubr.bf16.mxu0 %v976_v22 }
  0xe2   :  { %v823_v28 = vpop.f32.mrf.mxu0 }
  0xe4   :  { %v824_v30 = vpop.f32.mrf.mxu0 }
  0xe5   :  { %v825_v31 = vadd.f32 %v824_v30, %v823_v28 }
  0xe6   :  { %v826_v32 = vpop.f32.mrf.mxu0 }
  0xe7   :  { %v223_v33 = vadd.f32 %v825_v31, %v747_v29  ;;  %v598_v31 = vlaneseq }
  0xe8   :  { %v827_v34 = vpop.f32.mrf.mxu0 }
  0xe9   :  { %v228_v35 = vmax.f32 %v223_v33, 0.0  ;;  %v599_v32 = vshrl.u32 %v598_v31, 7  ;;  %v596_v34 = vld [vmem:[%s1264_s12] sm:$0x3] }
  0xeb   :  { %v229_v37 = vpack.c.bf16 %v228_v35, %v228_v35  ;;  %v600_v33 = vsub.s32 0, %v599_v32  ;;  %v604_v35 = vsub.s32 1, %v599_v32 }
  0xed   :  { %868 = vmatmul.mubr.bf16.vlgmr.msra.gmra.mxu1 %v229_v37  ;;  %v605_v37 = vrot.slane %v596_v34, %v604_v35 }
  0xee   :  { %872 = vmatpush3.bf16.msra.mxu1 %v932_v36  ;;  %879 = vmatprep.mubr.msk.bf16.mxu1 %vm975_vm0, %v974_v1  ;;  %v601_v36 = vrot.slane %v596_v34, %v600_v33 }
  0xef   :  { %873 = vmatprep.subr.bf16.mxu1 %v974_v1 }
  0xf2   :  { %874 = vmatpush3.bf16.msra.mxu1 %v933_v38 }
  0xf3   :  { %875 = vmatprep.subr.bf16.mxu1 %v974_v1 }
  0xf6   :  { %876 = vmatpush3.bf16.msra.mxu1 %v934_v39 }
  0xf7   :  { %877 = vmatprep.subr.bf16.mxu1 %v974_v1 }
  0xfa   :  { %878 = vmatpush3.bf16.msra.mxu1 %v935_v40 }
  0xfb   :  { %883 = vmatprep.subr.bf16.mxu1 %v974_v1 }
 0x1ad   :  { %v335_v42 = vpop.f32.mrf.mxu1 }
 0x1ae   :  { %v336_v43 = vadd.f32 %v766_v41, %v335_v42 }
 0x1af   :  { %v869_v44 = vpop.f32.mrf.mxu1 }
 0x1b0   :  { %v341_v45 = vmax.f32 %v336_v43, 0.0 }
 0x1b1   :  { %v338_v46 = vpop.f32.mrf.mxu1 }
 0x1b2   :  { %v342_v48 = vpack.c.bf16 %v341_v45, %v341_v45 }
 0x1b3   :  { %v870_v49 = vpop.f32.mrf.mxu1 }
 0x1b4   :  { %880 = vmatmul.mubr.msk.bf16.vlgmr.msra.gmra.mxu1 %vm382_vm1, %v342_v48 }
 0x1b5   :  { %884 = vmatpush3.bf16.msra.mxu1 %v936_v47  ;;  %887 = vmatprep.mubr.msk.bf16.mxu1 %vm975_vm0, %v974_v1 }
 0x1b6   :  { %885 = vmatprep.subr.bf16.mxu1 %v974_v1 }
 0x1b9   :  { %886 = vmatpush3.bf16.msra.mxu1 %v937_v50 }
 0x1ba   :  { %891 = vmatprep.subr.bf16.mxu1 %v974_v1 }
 0x274   :  { %v420_v52 = vpop.f32.mrf.mxu1 }
 0x275   :  { %v421_v53 = vadd.f32 %v775_v51, %v420_v52 }
 0x276   :  { %v881_v54 = vpop.f32.mrf.mxu1 }
 0x277   :  { %v426_v56 = vpack.c.bf16 %v421_v53, %v421_v53 }
 0x278   :  { %v423_v57 = vpop.f32.mrf.mxu1 }
 0x279   :  { %888 = vmatmul.mubr.msk.bf16.vlgmr.msra.gmra.mxu1 %vm450_vm2, %v426_v56 }
 0x27a   :  { %v882_v58 = vpop.f32.mrf.mxu1  ;;  %892 = vmatpush3.bf16.msra.mxu1 %v938_v55  ;;  %899 = vmatprep.mubr.msk.bf16.mxu1 %vm975_vm0, %v974_v1 }
 0x27b   :  { %893 = vmatprep.subr.bf16.mxu1 %v974_v1 }
 0x27e   :  { %894 = vmatpush3.bf16.msra.mxu1 %v939_v59 }
 0x27f   :  { %895 = vmatprep.subr.bf16.mxu1 %v974_v1 }
 0x282   :  { %896 = vmatpush3.bf16.msra.mxu1 %v940_v60 }
 0x283   :  { %897 = vmatprep.subr.bf16.mxu1 %v974_v1  ;;  %v945_v1 = vld [vmem:[%s1261_s11 + $0x60] ss:$8 sps:$4 sm:$0xff]  }
 0x284   :  { %691 = vmatpush1.bf16.msra.mxu0 %v945_v1 }
 0x285   :  { %692 = vmatprep.subr.bf16.mxu0 %v950_v2 }
 0x286   :  { %898 = vmatpush3.bf16.msra.mxu1 %v941_v61 }
 0x288   :  { %693 = vmatpush1.bf16.msra.mxu0 %v948_v3 }
 0x289   :  { %694 = vmatprep.subr.bf16.mxu0 %v953_v4 }
 0x28c   :  { %695 = vmatpush1.bf16.msra.mxu0 %v951_v5 }
 0x28d   :  { %696 = vmatprep.subr.bf16.mxu0 %v956_v6 }
 0x290   :  { %697 = vmatpush1.bf16.msra.mxu0 %v954_v7 }
 0x291   :  { %698 = vmatprep.subr.bf16.mxu0 %v959_v8 }
 0x294   :  { %699 = vmatpush1.bf16.msra.mxu0 %v957_v9 }
 0x295   :  { %700 = vmatprep.subr.bf16.mxu0 %v962_v10 }
 0x298   :  { %701 = vmatpush1.bf16.msra.mxu0 %v960_v11 }
 0x299   :  { %702 = vmatprep.subr.bf16.mxu0 %v965_v20 }
 0x29c   :  { %703 = vmatpush1.bf16.msra.mxu0 %v963_v21 }
 0x339   :  { %v488_v13 = vpop.f32.mrf.mxu1 }
 0x33a   :  { %v489_v14 = vadd.f32 %v781_v12, %v488_v13 }
 0x33b   :  { %v889_v15 = vpop.f32.mrf.mxu1 }
 0x33c   :  { %v494_v16 = vmax.f32 %v489_v14, 0.0 }
 0x33d   :  { %v491_v17 = vpop.f32.mrf.mxu1 }
 0x33e   :  { %v495_v18 = vpack.c.bf16 %v494_v16, %v494_v16 }
 0x33f   :  { %v890_v19 = vpop.f32.mrf.mxu1 }
 0x340   :  { %900 = vmatmul.mubr.msk.bf16.vlgmr.msra.gmra.mxu1 %vm382_vm1, %v495_v18 }
 0x400   :  { %v572_v24 = vpop.f32.mrf.mxu1 }
 0x401   :  { %v573_v25 = vadd.f32 %v785_v23, %v572_v24 }
 0x402   :  { %v901_v26 = vpop.f32.mrf.mxu1 }
 0x403   :  { %v578_v27 = vmax.f32 %v573_v25, 0.0 }
 0x404   :  { %v575_v28 = vpop.f32.mrf.mxu1 }
 0x405   :  { %v579_v29 = vpack.c.bf16 %v578_v27, %v578_v27 }
 0x406   :  { %v902_v30 = vpop.f32.mrf.mxu1 }
 0x407   :  { %721 = vmatmul.mubr.bf16.vlgmr.msra.gmra.mxu0 %v579_v29 }
 0x4c7   :  { %v722_v38 = vpop.f32.mrf.mxu0 }
 0x4c8   :  { %v723_v39 = vadd.f32 %v722_v38, %v601_v36 }
 0x4c9   :  { %v724_v40 = vpop.f32.mrf.mxu0 }
 0x4ca   :  { %v729_v41 = vmax.f32 %v723_v39, -30.0  ;;  %v725_v42 = vadd.f32 %v724_v40, %v605_v37 }
 0x4cb   :  { %v726_v43 = vpop.f32.mrf.mxu0 }
 0x4cc   :  { %v731_v44 = vsub.f32 0.0, %v729_v41  ;;  %v730_v45 = vmax.f32 %v725_v42, -30.0 }
 0x4cd   :  { %v727_v46 = vpop.f32.mrf.mxu0 }
 0x4ce   :  { %v733_v47 = vmul.f32 1.442695, %v731_v44  ;;  %v732_v48 = vsub.f32 0.0, %v730_v45 }
 0x4d0   :  { %966 = vpow2.f32 %v733_v47  ;;  %v735_v49 = vmul.f32 1.442695, %v732_v48 }
 0x4d2   :  { %968 = vpow2.f32 %v735_v49 }
 0x4dd   :  { %v967_v50 = vpop.eup %966 }
 0x4de   :  { %v737_v51 = vadd.f32 1.0, %v967_v50 }
 0x4df   :  { %v969_v52 = vpop.eup %968 }
 0x4e0   :  { %970 = vrcp.f32 %v737_v51  ;;  %v738_v53 = vadd.f32 1.0, %v969_v52 }
 0x4e2   :  { %972 = vrcp.f32 %v738_v53 }
 0x4ed   :  { %v971_v54 = vpop.eup %970 }
 0x4ee   :  { %741 = vst [vmem:[%s1265_s13] sm:$0xff] %v971_v54 }
 0x4ef   :  { %v973_v55 = vpop.eup %972 }
 0x4f0   :  { %742 = vst [vmem:[%s1265_s13 + $0x8] sm:$0xff] %v973_v55 }

</bundles_post_ra>
